<compile_context>
chip_gen: v5e
topology: v5e:2x2
jax: 0.10.0
libtpu: 0.0.40
codegen_flags: <defaults>
</compile_context>

<pallas_src>
import functools

import numpy as np
import jax
import jax.numpy as jnp
from jax.experimental import pallas as pl
from jax.experimental.pallas import tpu as pltpu


def _round_up(x, m):
    return (x + m - 1) // m * m


def _round_down(x, m):
    return x // m * m


def _stats_kernel(p_ref, w_ref, sum_ref, sq_ref, *, transposed):
    """Per-channel sum / sum-of-squares of W @ p (conv output without bias).

    transposed: p (CinK, tm), w (Cout, CinK) -> y (Cout, tm), reduce over lanes.
    natural   : p (tm, CinK), w (CinK, Cout) -> y (tm, Cout), reduce over sublanes.
    Partial accumulators are (1, 1, Cout) blocks, resident across the inner
    "arbitrary" grid axis; one block per megacore chunk -> no races.
    """
    @pl.when(pl.program_id(1) == 0)
    def _():
        sum_ref[...] = jnp.zeros_like(sum_ref)
        sq_ref[...] = jnp.zeros_like(sq_ref)

    if transposed:
        y = jnp.dot(w_ref[...], p_ref[...], preferred_element_type=jnp.float32)
        s1 = jnp.sum(y, axis=1)
        s2 = jnp.sum(y * y, axis=1)
    else:
        y = jnp.dot(p_ref[...], w_ref[...], preferred_element_type=jnp.float32)
        s1 = jnp.sum(y, axis=0)
        s2 = jnp.sum(y * y, axis=0)
    sum_ref[...] += s1.reshape(sum_ref.shape)
    sq_ref[...] += s2.reshape(sq_ref.shape)


def _apply_kernel(p_ref, w_ref, off_ref, o_ref, *, transposed):
    """Fused conv + BN affine: o = (scale-folded W) @ p + offset."""
    if transposed:
        y = jnp.dot(w_ref[...], p_ref[...], preferred_element_type=jnp.float32)  # (Cout, tm)
    else:
        y = jnp.dot(p_ref[...], w_ref[...], preferred_element_type=jnp.float32)  # (tm, Cout)
    o_ref[...] = (y + off_ref[...]).astype(o_ref.dtype)


def conv_n_bnorm(x, w, b, gamma, beta, *, kernel_size=1, stride=1, eps=1e-5,
                 mxu_dtype=jnp.bfloat16, target_tile_bytes=4 << 20, n_chunks=2):
    """x: (B, L, Cin) -> (B, L_out, Cout).

    Matches Conv_n_Bnorm.forward in training mode: Conv1d (no padding) followed by
    BatchNorm1d normalized with the biased batch statistics over (batch, length).
    """
    B, L, Cin = x.shape
    Cout = w.shape[0]
    K = kernel_size
    L_out = (L - (K - 1) - 1) // stride + 1
    M = B * L_out
    CinK = Cin * K

    # ---- im2col in natural (M, Cin*K) layout; column order ci*K + k matches
    # ---- w.reshape(Cout, Cin*K). ----
    if K == 1:
        patches = x[:, ::stride, :][:, :L_out, :].reshape(M, CinK)
    else:
        # TODO(synk): gather-based im2col duplicates x ~K x in HBM; an in-kernel
        # overlapping-window DMA (memory_space=pl.ANY + make_async_copy) would cut
        # the dominant patches traffic ~K x for kernel_size > 1.
        idx = stride * jnp.arange(L_out)[:, None] + jnp.arange(K)[None, :]
        patches = jnp.transpose(x[:, idx, :], (0, 1, 3, 2)).reshape(M, CinK)

    natural = (Cout % 128 == 0)        # lane-dense (M, Cout) stores, no transposes
    bpe = np.dtype(mxu_dtype).itemsize

    # ---- VMEM budget: v7x has only 64 MiB / TensorCore; leave headroom ----
    try:
        vmem_cap = int(pltpu.get_tpu_info().vmem_capacity_bytes)
    except Exception:
        vmem_cap = 64 << 20            # conservative fallback (v7x per-core VMEM)
    vmem_budget = max(vmem_cap - (16 << 20), 16 << 20)

    # ---- tile size: aim for multi-MiB patch tiles, clamp by VMEM and problem ----
    tm = target_tile_bytes // max(1, CinK * bpe)
    per_m_bytes = 2 * CinK * bpe + 2 * Cout * 4 + 8     # double-buffered in/out per M row
    tm = min(tm, max(128, vmem_budget // per_m_bytes))
    tm = max(128, _round_down(tm, 128))
    tm = min(tm, _round_up(M, 128))

    n_tiles = pl.cdiv(M, tm)
    n_chunks = max(1, min(n_chunks, n_tiles))           # pass-1 megacore split (v7x: keep 2)
    chunk_tiles = pl.cdiv(n_tiles, n_chunks)
    n_tiles = n_chunks * chunk_tiles
    M_pad = n_tiles * tm

    # Zero-pad M *before* any transpose so XLA fuses the pad into the im2col
    # producer; zero rows contribute exactly 0 to the (bias-free) statistics.
    patches = patches.astype(mxu_dtype)
    if M_pad != M:
        patches = jnp.pad(patches, ((0, M_pad - M), (0, 0)))
    if not natural:
        patches = patches.T                              # (CinK, M_pad): M on lane axis

    w2 = w.reshape(Cout, CinK).astype(jnp.float32)
    w_stats = (w2.T if natural else w2).astype(mxu_dtype)

    tile_bytes = tm * CinK * bpe + tm * Cout * 4
    vmem_limit = int(min(max(2 * tile_bytes + (8 << 20), 16 << 20), vmem_budget))

    # ---- pass 1: per-chunk partial sum / sum-sq of W@p (no bias, no masking) ----
    if natural:
        p_spec1 = pl.BlockSpec((tm, CinK), lambda c, i: (c * chunk_tiles + i, 0))
    else:
        p_spec1 = pl.BlockSpec((CinK, tm), lambda c, i: (0, c * chunk_tiles + i))
    psum, psq = pl.pallas_call(
        functools.partial(_stats_kernel, transposed=not natural),
        out_shape=(jax.ShapeDtypeStruct((n_chunks, 1, Cout), jnp.float32),
                   jax.ShapeDtypeStruct((n_chunks, 1, Cout), jnp.float32)),
        grid_spec=pltpu.PrefetchScalarGridSpec(
            num_scalar_prefetch=0,
            grid=(n_chunks, chunk_tiles),
            in_specs=[p_spec1,
                      pl.BlockSpec(w_stats.shape, lambda c, i: (0, 0))],
            out_specs=(pl.BlockSpec((1, 1, Cout), lambda c, i: (c, 0, 0)),
                       pl.BlockSpec((1, 1, Cout), lambda c, i: (c, 0, 0))),
        ),
        compiler_params=pltpu.CompilerParams(
            dimension_semantics=("parallel", "arbitrary"),
            vmem_limit_bytes=vmem_limit,
        ),
    )(patches, w_stats)

    # ---- tiny per-channel BN math on (Cout,) vectors (hoisted out of the kernels) ----
    s1 = jnp.sum(psum, axis=0).reshape(Cout)
    s2 = jnp.sum(psq, axis=0).reshape(Cout)
    mean_wp = s1 / M
    # TODO(synk): E[y^2]-E[y]^2 can cancel for very large M / large channel means; a
    # centered second pass (or f32 Gram accumulation) is more robust in that regime.
    var = jnp.maximum(s2 / M - mean_wp * mean_wp, 0.0)   # bias-invariant variance
    scale = gamma.astype(jnp.float32) * jax.lax.rsqrt(var + eps)
    # Training-mode BN: out = (Wp + b - mean(Wp) - b) * scale + beta, so the conv
    # bias cancels exactly; fold scale into the weights, keep only a per-channel offset.
    offset = beta.astype(jnp.float32) - scale * mean_wp

    w_apply = scale[:, None] * w2                        # (Cout, CinK), tiny f32 op
    w_apply = (w_apply.T if natural else w_apply).astype(mxu_dtype)
    off = offset.reshape((1, Cout) if natural else (Cout, 1))

    # ---- pass 2: recompute conv with scale-folded weights + add offset ----
    if natural:
        out_shape = jax.ShapeDtypeStruct((M_pad, Cout), jnp.float32)
        p_spec2 = pl.BlockSpec((tm, CinK), lambda i: (i, 0))
        o_spec2 = pl.BlockSpec((tm, Cout), lambda i: (i, 0))
    else:
        out_shape = jax.ShapeDtypeStruct((Cout, M_pad), jnp.float32)
        p_spec2 = pl.BlockSpec((CinK, tm), lambda i: (0, i))
        o_spec2 = pl.BlockSpec((Cout, tm), lambda i: (0, i))

    y = pl.pallas_call(
        functools.partial(_apply_kernel, transposed=not natural),
        out_shape=out_shape,
        grid_spec=pltpu.PrefetchScalarGridSpec(
            num_scalar_prefetch=0,
            grid=(n_tiles,),
            in_specs=[p_spec2,
                      pl.BlockSpec(w_apply.shape, lambda i: (0, 0)),
                      pl.BlockSpec(off.shape, lambda i: (0, 0))],
            out_specs=o_spec2,
        ),
        compiler_params=pltpu.CompilerParams(
            dimension_semantics=("parallel",),
            vmem_limit_bytes=vmem_limit,
        ),
    )(patches, w_apply, off)

    # ---- back to the module's (B, L_out, Cout) layout ----
    if natural:
        out = y[:M].reshape(B, L_out, Cout)              # already in natural layout
    else:
        out = jnp.transpose(y[:, :M]).reshape(B, L_out, Cout)
    return out.astype(x.dtype)


def _reference(x, w, b, gamma, beta, *, kernel_size, stride, eps=1e-5):
    """Pure-JAX reference mirroring the PyTorch forward (training-mode BN)."""
    xt = jnp.transpose(x, (0, 2, 1))                     # (B, Cin, L)
    conv = jax.lax.conv_general_dilated(
        xt, w, window_strides=(stride,), padding="VALID",
        dimension_numbers=("NCH", "OIH", "NCH"),
    ) + b[None, :, None]                                 # (B, Cout, L_out)
    mean = conv.mean(axis=(0, 2), keepdims=True)
    var = conv.var(axis=(0, 2), keepdims=True)           # biased, like PyTorch BN fwd
    bn = (conv - mean) / jnp.sqrt(var + eps) * gamma[None, :, None] + beta[None, :, None]
    return jnp.transpose(bn, (0, 2, 1))                  # (B, L_out, Cout)


if __name__ == "__main__":
    key = jax.random.PRNGKey(0)

    def make(B, L, Cin, Cout, K):
        ks = jax.random.split(key, 5)
        x = jax.random.normal(ks[0], (B, L, Cin), dtype=jnp.float32)
        w = jax.random.normal(ks[1], (Cout, Cin, K), dtype=jnp.float32) * 0.1
        b = jax.random.normal(ks[2], (Cout,), dtype=jnp.float32) * 0.1
        gamma = 1.0 + 0.1 * jax.random.normal(ks[3], (Cout,), dtype=jnp.float32)
        beta = 0.1 * jax.random.normal(ks[4], (Cout,), dtype=jnp.float32)
        return x, w, b, gamma, beta

    cases = [
        # (B, L, Cin, Cout, K, stride, mxu_dtype, atol)
        (2, 16, 4,   8, 1, 1, jnp.bfloat16, 5e-2),   # transposed path, bf16 MXU inputs
        (2, 16, 4,   8, 3, 2, jnp.float32,  1e-4),   # transposed path, K>1 im2col, f32
        (2, 16, 4, 128, 1, 1, jnp.bfloat16, 5e-2),   # natural (M, Cout) path, Cout%128==0
    ]
    for B, L, Cin, Cout, K, stride, mdt, atol in cases:
        x, w, b, gamma, beta = make(B, L, Cin, Cout, K)
        out = conv_n_bnorm(x, w, b, gamma, beta, kernel_size=K, stride=stride,
                           mxu_dtype=mdt)
        out = jax.block_until_ready(out)
        ref = _reference(x, w, b, gamma, beta, kernel_size=K, stride=stride)
        assert out.shape == ref.shape, (out.shape, ref.shape)
        err = float(jnp.max(jnp.abs(out - ref)))
        assert err <= atol, (Cout, K, stride, str(mdt), err)

    print("KERNEL_OK")
</pallas_src>

<mosaic_0001>
module attributes {stable_mosaic.version = 11 : i64} {
  func.func @_stats_kernel(%arg0: i32, %arg1: i32, %arg2: memref<4x128xbf16, #tpu.memory_space<vmem>>, %arg3: memref<8x4xbf16, #tpu.memory_space<vmem>>, %arg4: memref<1x1x8xf32, #tpu.memory_space<vmem>>, %arg5: memref<1x1x8xf32, #tpu.memory_space<vmem>>) attributes {dimension_semantics = [#tpu.dimension_semantics<parallel>, #tpu.dimension_semantics<arbitrary>], iteration_bounds = array<i64: 1, 1>, scalar_prefetch = 0 : i64, scratch_operands = 0 : i64, tpu.core_type = #tpu.core_type<tc>, window_params = [{transform_indices = @transform_0, window_bounds = array<i64: 4, 128>}, {pipeline_mode = #tpu.pipeline_mode<synchronous>, transform_indices = @transform_1, window_bounds = array<i64: 8, 4>}, {transform_indices = @transform_2, window_bounds = array<i64: 1, 1, 8>}, {transform_indices = @transform_3, window_bounds = array<i64: 1, 1, 8>}]} {
    %c0_i32 = arith.constant 0 : i32
    %0 = arith.cmpi eq, %arg1, %c0_i32 : i32
    %1 = arith.extui %0 : i1 to i32
    %c0_i32_0 = arith.constant 0 : i32
    %2 = arith.cmpi ne, %1, %c0_i32_0 : i32
    scf.if %2 {
      %cst_18 = arith.constant 0.000000e+00 : f32
      %17 = vector.broadcast %cst_18 : f32 to vector<1x1x8xf32>
      %c0_19 = arith.constant 0 : index
      %c0_20 = arith.constant 0 : index
      %c0_21 = arith.constant 0 : index
      %18 = vector.load %arg4[%c0_19, %c0_20, %c0_21] : memref<1x1x8xf32, #tpu.memory_space<vmem>>, vector<1x1x8xf32>
      tpu.vector_store %arg4[%c0_19, %c0_20, %c0_21], %17 {strides = array<i32>} : memref<1x1x8xf32, #tpu.memory_space<vmem>>, vector<1x1x8xf32>,
      %cst_22 = arith.constant 0.000000e+00 : f32
      %19 = vector.broadcast %cst_22 : f32 to vector<1x1x8xf32>
      %c0_23 = arith.constant 0 : index
      %c0_24 = arith.constant 0 : index
      %c0_25 = arith.constant 0 : index
      %20 = vector.load %arg5[%c0_23, %c0_24, %c0_25] : memref<1x1x8xf32, #tpu.memory_space<vmem>>, vector<1x1x8xf32>
      tpu.vector_store %arg5[%c0_23, %c0_24, %c0_25], %19 {strides = array<i32>} : memref<1x1x8xf32, #tpu.memory_space<vmem>>, vector<1x1x8xf32>,
    } else {
    }
    %c0 = arith.constant 0 : index
    %c0_1 = arith.constant 0 : index
    %3 = vector.load %arg3[%c0, %c0_1] : memref<8x4xbf16, #tpu.memory_space<vmem>>, vector<8x4xbf16>
    %c0_2 = arith.constant 0 : index
    %c0_3 = arith.constant 0 : index
    %4 = vector.load %arg2[%c0_2, %c0_3] : memref<4x128xbf16, #tpu.memory_space<vmem>>, vector<4x128xbf16>
    %cst = arith.constant dense<0.000000e+00> : vector<8x128xf32>
    %5 = tpu.matmul %3, %4, %cst {dimension_numbers = #tpu.dot_dimension_numbers<[1], [0], [0], [1], [0, 0, 1, 1], [], []>} : vector<8x4xbf16>, vector<4x128xbf16>, vector<8x128xf32> -> vector<8x128xf32>
    %cst_4 = arith.constant dense<0.000000e+00> : vector<8xf32>
    %6 = vector.multi_reduction <add>, %5, %cst_4 [1] : vector<8x128xf32> to vector<8xf32>
    %7 = arith.mulf %5, %5 : vector<8x128xf32>
    %cst_5 = arith.constant dense<0.000000e+00> : vector<8xf32>
    %8 = vector.multi_reduction <add>, %7, %cst_5 [1] : vector<8x128xf32> to vector<8xf32>
    %c0_6 = arith.constant 0 : index
    %c0_7 = arith.constant 0 : index
    %c0_8 = arith.constant 0 : index
    %9 = vector.load %arg4[%c0_6, %c0_7, %c0_8] : memref<1x1x8xf32, #tpu.memory_space<vmem>>, vector<1x1x8xf32>
    %10 = vector.shape_cast %6 : vector<8xf32> to vector<1x1x8xf32>
    %11 = arith.addf %9, %10 : vector<1x1x8xf32>
    %c0_9 = arith.constant 0 : index
    %c0_10 = arith.constant 0 : index
    %c0_11 = arith.constant 0 : index
    %12 = vector.load %arg4[%c0_9, %c0_10, %c0_11] : memref<1x1x8xf32, #tpu.memory_space<vmem>>, vector<1x1x8xf32>
    tpu.vector_store %arg4[%c0_9, %c0_10, %c0_11], %11 {strides = array<i32>} : memref<1x1x8xf32, #tpu.memory_space<vmem>>, vector<1x1x8xf32>,
    %c0_12 = arith.constant 0 : index
    %c0_13 = arith.constant 0 : index
    %c0_14 = arith.constant 0 : index
    %13 = vector.load %arg5[%c0_12, %c0_13, %c0_14] : memref<1x1x8xf32, #tpu.memory_space<vmem>>, vector<1x1x8xf32>
    %14 = vector.shape_cast %8 : vector<8xf32> to vector<1x1x8xf32>
    %15 = arith.addf %13, %14 : vector<1x1x8xf32>
    %c0_15 = arith.constant 0 : index
    %c0_16 = arith.constant 0 : index
    %c0_17 = arith.constant 0 : index
    %16 = vector.load %arg5[%c0_15, %c0_16, %c0_17] : memref<1x1x8xf32, #tpu.memory_space<vmem>>, vector<1x1x8xf32>
    tpu.vector_store %arg5[%c0_15, %c0_16, %c0_17], %15 {strides = array<i32>} : memref<1x1x8xf32, #tpu.memory_space<vmem>>, vector<1x1x8xf32>,
    return
  }
  func.func @transform_0(%arg0: i32, %arg1: i32) -> (i32, i32) {
    %c1_i32 = arith.constant 1 : i32
    %0 = arith.muli %arg0, %c1_i32 : i32
    %1 = arith.addi %0, %arg1 : i32
    %c0_i32 = arith.constant 0 : i32
    %c0_i32_0 = arith.constant 0 : i32
    return %c0_i32, %1 : i32, i32
  }
  func.func @transform_1(%arg0: i32, %arg1: i32) -> (i32, i32) {
    %c0_i32 = arith.constant 0 : i32
    %c0_i32_0 = arith.constant 0 : i32
    %c0_i32_1 = arith.constant 0 : i32
    return %c0_i32, %c0_i32_0 : i32, i32
  }
  func.func @transform_2(%arg0: i32, %arg1: i32) -> (i32, i32, i32) {
    %c0_i32 = arith.constant 0 : i32
    %c0_i32_0 = arith.constant 0 : i32
    %c0_i32_1 = arith.constant 0 : i32
    return %arg0, %c0_i32, %c0_i32_0 : i32, i32, i32
  }
  func.func @transform_3(%arg0: i32, %arg1: i32) -> (i32, i32, i32) {
    %c0_i32 = arith.constant 0 : i32
    %c0_i32_0 = arith.constant 0 : i32
    %c0_i32_1 = arith.constant 0 : i32
    return %arg0, %c0_i32, %c0_i32_0 : i32, i32, i32
  }
}

</mosaic_0001>

<bundles_post_ra>
// kernel: tpu_custom_call.1
= control target key start
LH: loop header
LB: loop body
LE: loop exit
PB: predicated region body
PF: predicated region fallthrough
CT: control target
= control target key end

     0   :  { %9 = vsyncpa [#allocation3], 0  ;;  %vm46_vm0 = vcmask 1041408   ;;  %s274_s0 = inlined_call_operand.vmem [shape: bf16[4,128], index: 0, kind: input, shape index: {}]   ;;  %s275_s1 = inlined_call_operand.vmem [shape: bf16[8,4], index: 1, kind: input, shape index: {}]   ;;  %s276_s2 = inlined_call_operand.hbm [shape: f32[1,1,8], index: 2, kind: output, shape index: {0}]   ;;  %s277_s3 = inlined_call_operand.hbm [shape: f32[1,1,8], index: 3, kind: output, shape index: {1}]  }
   0x1   :  { %v41_v0 = vld [vmem:[%s274_s0] sm:$0x3] }
   0x2   :  { %v48_v1 = vsel %vm46_vm0, %v41_v0, 0 }
   0x3   :  { %10 = vsyncpa [#allocation5], 0  ;;  %57 = vmatpush.bf16.msra.mxu0 %v48_v1  ;;  %v40_v2 = vld [vmem:[%s275_s1] sm:$0xf]  ;;  %vm42_vm1 = vcmask 31744   ;;  %v234_v6 = vmov 0   ;;  %v97_v28 = vlaneseq }
   0x4   :  { %180 = vset.pattern.permute.xlu1 %v234_v6  ;;  %181 = vset.pattern.permute.xlu0 %v234_v6  ;;  %vm37_vm2 = vcmask 57344   ;;  %v235_v27 = vmov 0.0   ;;  %s236_s0 = smov [#allocation2]   ;;  %s144_s18 = sshll.u32 %s276_s2, 4  ;;  %s145_s18 = int_to_ptr.hbm [resolvable:$true] %s144_s18 }
   0x5   :  { %38 = vst.msk [vmem:[#allocation2] sm:$0x1] %vm37_vm2, %v235_v27  ;;  %v98_v29 = vand.u32 127, %v97_v28  ;;  %s142_s1 = sshll.u32 %s236_s0, 4  ;;  %s237_s19 = smov [#allocation4]   ;;  %s143_s1 = int_to_ptr.vmem [resolvable:$true] %s142_s1 }
   0x6   :  { %175 = vmatmul.msk.bf16.vlgmr.msra.gmra.mxu0 %vm42_vm1, %v40_v2  ;;  %39 = vst.msk [vmem:[#allocation4] sm:$0x1] %vm37_vm2, %v235_v27  ;;  %s153_s20 = sshll.u32 %s237_s19, 4  ;;  %s155_s23 = sshll.u32 %s277_s3, 4  ;;  %s154_s20 = int_to_ptr.vmem [resolvable:$true] %s153_s20  ;;  %s156_s23 = int_to_ptr.hbm [resolvable:$true] %s155_s23 }
   0xc   :  { %v68_v31 = vld [vmem:[#allocation2] sm:$0x1] }
   0xd   :  { %v104_v35 = vld [vmem:[#allocation4] sm:$0x1] }
  0x83   :  { %v59_v3 = vpop.f32.mrf.mxu0 }
  0x84   :  { %63 = vadd.xlane.f32.xlu0 %v59_v3  ;;  %v65_v4 = vmul.f32 %v59_v3, %v59_v3 }
  0x8b   :  { %v61_v5 = vpop.f32.mrf.mxu0 }
  0x8c   :  { %66 = vadd.xlane.f32.xlu0 %v65_v4 }
  0xf7   :  { %v64_v7 = vpop.xlane.xlu0 %63 }
  0xf8   :  { %v70_v8 = vperm.slane %v64_v7, 0  ;;  %v71_v9 = vperm.slane %v64_v7, 1  ;;  %v72_v10 = vperm.slane %v64_v7, 2  ;;  %v73_v11 = vperm.slane %v64_v7, 3 }
  0xf9   :  { %v74_v12 = vperm.slane %v64_v7, 4  ;;  %v75_v13 = vperm.slane %v64_v7, 5  ;;  %v76_v14 = vperm.slane %v64_v7, 6  ;;  %v77_v15 = vperm.slane %v64_v7, 7 }
  0xfa   :  { %78 = vst [vmem:[#allocation1] ss:$9 sm:$0xff] %v70_v8 }
  0xfb   :  { %80 = vst [vmem:[#allocation1 + $0x1] ss:$9 sm:$0xff] %v71_v9 }
  0xfc   :  { %82 = vst [vmem:[#allocation1 + $0x2] ss:$9 sm:$0xff] %v72_v10 }
  0xfd   :  { %84 = vst [vmem:[#allocation1 + $0x3] ss:$9 sm:$0xff] %v73_v11 }
  0xfe   :  { %86 = vst [vmem:[#allocation1 + $0x4] ss:$9 sm:$0xff] %v74_v12 }
  0xff   :  { %88 = vst [vmem:[#allocation1 + $0x5] ss:$9 sm:$0xff] %v75_v13  ;;  %v67_v16 = vpop.xlane.xlu0 %66 }
 0x100   :  { %90 = vst [vmem:[#allocation1 + $0x6] ss:$9 sm:$0xff] %v76_v14  ;;  %v106_v17 = vperm.slane %v67_v16, 0  ;;  %v107_v18 = vperm.slane %v67_v16, 1  ;;  %v108_v19 = vperm.slane %v67_v16, 2  ;;  %v109_v20 = vperm.slane %v67_v16, 3 }
 0x101   :  { %92 = vst [vmem:[#allocation1 + $0x7] ss:$9 sm:$0xff] %v77_v15  ;;  %v110_v22 = vperm.slane %v67_v16, 4  ;;  %v111_v23 = vperm.slane %v67_v16, 5  ;;  %v112_v24 = vperm.slane %v67_v16, 6  ;;  %v113_v25 = vperm.slane %v67_v16, 7 }
 0x108   :  { %v93_v21 = vld [vmem:[#allocation1] sm:$0xff] }
 0x109   :  { %95 = vperm.xlu1 %180, %v93_v21   ;;  %114 = vst [vmem:[#allocation1] ss:$9 sm:$0xff] %v106_v17 }
 0x10a   :  { %116 = vst [vmem:[#allocation1 + $0x1] ss:$9 sm:$0xff] %v107_v18 }
 0x10b   :  { %118 = vst [vmem:[#allocation1 + $0x2] ss:$9 sm:$0xff] %v108_v19 }
 0x10c   :  { %120 = vst [vmem:[#allocation1 + $0x3] ss:$9 sm:$0xff] %v109_v20 }
 0x10d   :  { %122 = vst [vmem:[#allocation1 + $0x4] ss:$9 sm:$0xff] %v110_v22 }
 0x10e   :  { %124 = vst [vmem:[#allocation1 + $0x5] ss:$9 sm:$0xff] %v111_v23 }
 0x10f   :  { %126 = vst [vmem:[#allocation1 + $0x6] ss:$9 sm:$0xff] %v112_v24 }
 0x110   :  { %128 = vst [vmem:[#allocation1 + $0x7] ss:$9 sm:$0xff] %v113_v25 }
 0x117   :  { %v129_v26 = vld [vmem:[#allocation1] sm:$0xff] }
 0x118   :  { %131 = vperm.xlu1 %180, %v129_v26  }
 0x17b   :  { %v96_v30 = vpop.permute.xlu1 %95 }
 0x17c   :  { %v99_v32 = vperm.slane %v96_v30, %v98_v29 }
 0x17e   :  { %v101_v33 = vadd.f32 %v99_v32, %v68_v31 }
 0x180   :  { %103 = vst.msk [vmem:[#allocation2] sm:$0x1] %vm37_vm2, %v101_v33 }
 0x181   :  { %147 = dma.vmem_to_hbm [thread:$0]  %s143_s1, 16, %s145_s18, [#allocation3]  }
 0x18a   :  { %v132_v34 = vpop.permute.xlu1 %131 }
 0x18b   :  { %v133_v36 = vperm.slane %v132_v34, %v98_v29 }
 0x18d   :  { %v135_v37 = vadd.f32 %v133_v36, %v104_v35 }
 0x18f   :  { %136 = vst.msk [vmem:[#allocation4] sm:$0x1] %vm37_vm2, %v135_v37 }
 0x190   :  { %158 = dma.vmem_to_hbm [thread:$0]  %s154_s20, 16, %s156_s23, [#allocation5]  }
 0x191   :  { %230 = dma.done.wait [#allocation3], 16  }
 0x192   :  { %231 = vsyncadd [#allocation3], 4294967280 }
 0x193   :  { %232 = dma.done.wait [#allocation5], 16  }
 0x194   :  { %233 = vsyncadd [#allocation5], 4294967280 }
 0x195   :  { %167 = vsyncpa [#allocation3], 1 }
 0x196   :  { %168 = vsyncpa [#allocation5], 1 }

</bundles_post_ra>
